<compile_context>
chip_gen: v6e
topology: v6e:2x2x1
jax: 0.10.0
libtpu: 0.0.40
codegen_flags: <defaults>
</compile_context>

<pallas_src>
import functools

import jax
import jax.numpy as jnp
from jax import lax
from jax.experimental import pallas as pl
from jax.experimental.pallas import tpu as pltpu


def _attn_head_kernel(xq_ref, xkv_ref, wq_ref, wk_ref, wv_ref, wp_ref,
                      o_ref, acc_ref, *,
                      scale: float, emphasis_factor: float,
                      compute_dtype, approx_recip: bool):
    """One grid step == (batch b, query tile qi, head h). Head axis is the
    innermost (reduction) axis; the (block_q, C) f32 accumulator collects the
    per-head contribution to the output projection."""
    h = pl.program_id(2)
    n_head = pl.num_programs(2)

    @pl.when(h == 0)
    def _():
        acc_ref[...] = jnp.zeros_like(acc_ref)

    xq = xq_ref[0]           # (block_q, C)  compute_dtype
    xkv = xkv_ref[0]         # (T, C)        compute_dtype
    wq = wq_ref[0]           # (C, hd)
    wk = wk_ref[0]           # (C, hd)
    wv = wv_ref[0]           # (C, hd)
    wp = wp_ref[0]           # (hd, C)

    # Per-head projections straight from x (no (T, 3C) intermediate).
    q = jnp.dot(xq, wq, preferred_element_type=jnp.float32).astype(compute_dtype)
    k = jnp.dot(xkv, wk, preferred_element_type=jnp.float32).astype(compute_dtype)
    v = jnp.dot(xkv, wv, preferred_element_type=jnp.float32).astype(compute_dtype)

    # scores = q @ k^T / sqrt(hd), contracting head_dim on both operands
    # (no explicit transpose of k).
    scores = lax.dot_general(q, k, (((1,), (1,)), ((), ())),
                             preferred_element_type=jnp.float32) * scale

    # emphasis on key position 0: single (1, T) row, broadcast-added.
    t_keys = scores.shape[-1]
    col0 = lax.broadcasted_iota(jnp.int32, (1, t_keys), 1) == 0
    scores = scores + jnp.where(col0, jnp.float32(emphasis_factor),
                                jnp.float32(0.0))

    # Softmax over keys (f32 throughout).
    m = jnp.max(scores, axis=-1, keepdims=True)
    e = jnp.exp(scores - m)
    denom = jnp.sum(e, axis=-1, keepdims=True)
    probs = e * pl.reciprocal(denom, approx=approx_recip)

    head_out = jnp.dot(probs.astype(compute_dtype), v,
                       preferred_element_type=jnp.float32)        # (block_q, hd)

    # Per-head slice of the output projection, accumulated (replaces concat).
    acc_ref[...] += jnp.dot(head_out.astype(compute_dtype), wp,
                            preferred_element_type=jnp.float32)   # (block_q, C)

    @pl.when(h == n_head - 1)
    def _():
        o_ref[0] = acc_ref[...].astype(o_ref.dtype)


def custom_self_attention_with_bias(x, w_qkv, w_proj, *, n_head: int,
                                    emphasis_factor: float,
                                    compute_dtype=jnp.bfloat16,
                                    block_q=None):
    """x: (B, T, C); w_qkv: (C, 3C); w_proj: (C, C).

    compute_dtype: dtype of MXU operands (bf16 default; accumulation is f32).
    """
    B, T, C = x.shape
    assert C % n_head == 0, "n_dim must be divisible by n_head"
    hd = C // n_head
    out_dtype = x.dtype
    scale = 1.0 / float(hd) ** 0.5

    # Query-tile size: multiple of 8 (sublane) or the full T.
    if block_q is None:
        block_q = T if T <= 512 else 512
    if T % block_q != 0 or (block_q != T and block_q % 8 != 0):
        block_q = T
    n_q = T // block_q

    # Pre-split weights into per-head panels so BlockSpec delivers the slices.
    w_q, w_k, w_v = jnp.split(w_qkv, 3, axis=1)                  # each (C, C)

    def _per_head_in(w):                                          # (C, C) -> (H, C, hd)
        return w.reshape(C, n_head, hd).transpose(1, 0, 2).astype(compute_dtype)

    wq_h = _per_head_in(w_q)
    wk_h = _per_head_in(w_k)
    wv_h = _per_head_in(w_v)
    wp_h = w_proj.reshape(n_head, hd, C).astype(compute_dtype)    # (H, hd, C)
    x_c = x.astype(compute_dtype)

    approx_recip = jnp.dtype(compute_dtype) != jnp.dtype(jnp.float32)
    kernel = functools.partial(
        _attn_head_kernel, scale=scale,
        emphasis_factor=float(emphasis_factor),
        compute_dtype=compute_dtype, approx_recip=approx_recip)

    flops = 2 * B * T * C * (3 * C + C) + 4 * B * T * T * C
    bytes_accessed = (2 * B * T * C) * x.dtype.itemsize + \
                     (w_qkv.size + w_proj.size) * jnp.dtype(compute_dtype).itemsize
    cost = pl.CostEstimate(flops=flops,
                           transcendentals=B * n_head * T * T,
                           bytes_accessed=bytes_accessed)

    return pl.pallas_call(
        kernel,
        out_shape=jax.ShapeDtypeStruct((B, T, C), out_dtype),
        grid_spec=pltpu.PrefetchScalarGridSpec(
            num_scalar_prefetch=0,
            grid=(B, n_q, n_head),                       # head = innermost reduction
            in_specs=[
                # x for the query tile
                pl.BlockSpec((1, block_q, C), lambda b, qi, h: (b, qi, 0)),
                # x for keys/values (full sequence of this batch element)
                pl.BlockSpec((1, T, C), lambda b, qi, h: (b, 0, 0)),
                # per-head weight panels (slicing done by the DMA, not the VPU)
                pl.BlockSpec((1, C, hd), lambda b, qi, h: (h, 0, 0)),
                pl.BlockSpec((1, C, hd), lambda b, qi, h: (h, 0, 0)),
                pl.BlockSpec((1, C, hd), lambda b, qi, h: (h, 0, 0)),
                pl.BlockSpec((1, hd, C), lambda b, qi, h: (h, 0, 0)),
            ],
            out_specs=pl.BlockSpec((1, block_q, C), lambda b, qi, h: (b, qi, 0)),
            scratch_shapes=[pltpu.VMEM((block_q, C), jnp.float32)],
        ),
        compiler_params=pltpu.CompilerParams(
            dimension_semantics=("parallel", "parallel", "arbitrary"),
            vmem_limit_bytes=32 * 1024 * 1024),
        cost_estimate=cost,
    )(x_c, x_c, wq_h, wk_h, wv_h, wp_h)


def _reference(x, w_qkv, w_proj, *, n_head, emphasis_factor):
    B, T, C = x.shape
    hd = C // n_head
    qkv = x @ w_qkv
    q, k, v = jnp.split(qkv, 3, axis=-1)
    q = q.reshape(B, T, n_head, hd).transpose(0, 2, 1, 3)
    k = k.reshape(B, T, n_head, hd).transpose(0, 2, 1, 3)
    v = v.reshape(B, T, n_head, hd).transpose(0, 2, 1, 3)
    scores = jnp.einsum("bhtd,bhsd->bhts", q, k) / (hd ** 0.5)
    scores = scores.at[:, :, :, 0].add(emphasis_factor)
    probs = jax.nn.softmax(scores, axis=-1)
    out = jnp.einsum("bhts,bhsd->bhtd", probs, v)
    out = out.transpose(0, 2, 1, 3).reshape(B, T, C)
    return out @ w_proj


if __name__ == "__main__":
    # REPLConfig-equivalent small config: n_dim=32, n_head=4, dropout=0 (eval).
    B, T, C, n_head = 2, 8, 32, 4
    emphasis_factor = 0.5

    key = jax.random.PRNGKey(0)
    kx, kq, kp = jax.random.split(key, 3)
    x = jax.random.normal(kx, (B, T, C), dtype=jnp.float32)
    # Deterministic init mimicking nn.Linear's U(-1/sqrt(fan_in), 1/sqrt(fan_in)).
    bound = 1.0 / (C ** 0.5)
    w_qkv = jax.random.uniform(kq, (C, 3 * C), jnp.float32, -bound, bound)
    w_proj = jax.random.uniform(kp, (C, C), jnp.float32, -bound, bound)

    y_ref = _reference(x, w_qkv, w_proj, n_head=n_head,
                       emphasis_factor=emphasis_factor)

    # Exact (f32 compute) path — tight numerical check vs reference.
    y_f32 = custom_self_attention_with_bias(
        x, w_qkv, w_proj, n_head=n_head, emphasis_factor=emphasis_factor,
        compute_dtype=jnp.float32)
    y_f32 = jax.block_until_ready(y_f32)
    assert y_f32.shape == (B, T, C)
    assert jnp.allclose(y_f32, y_ref, atol=1e-5, rtol=1e-5), \
        "f32 kernel mismatch vs reference"

    # Fast path (bf16 MXU operands, f32 accumulation, approx reciprocal).
    y_bf16 = custom_self_attention_with_bias(
        x, w_qkv, w_proj, n_head=n_head, emphasis_factor=emphasis_factor)
    y_bf16 = jax.block_until_ready(y_bf16)
    assert y_bf16.shape == (B, T, C) and y_bf16.dtype == x.dtype
    assert jnp.allclose(y_bf16, y_ref, atol=3e-2, rtol=3e-2), \
        "bf16 kernel mismatch vs reference"

    print("KERNEL_OK")
</pallas_src>

<mosaic_0001>
module attributes {stable_mosaic.version = 11 : i64} {
  func.func @_attn_head_kernel(%arg0: i32, %arg1: i32, %arg2: i32, %arg3: memref<1x8x32xf32, #tpu.memory_space<vmem>>, %arg4: memref<1x8x32xf32, #tpu.memory_space<vmem>>, %arg5: memref<1x32x8xf32, #tpu.memory_space<vmem>>, %arg6: memref<1x32x8xf32, #tpu.memory_space<vmem>>, %arg7: memref<1x32x8xf32, #tpu.memory_space<vmem>>, %arg8: memref<1x8x32xf32, #tpu.memory_space<vmem>>, %arg9: memref<1x8x32xf32, #tpu.memory_space<vmem>>, %arg10: memref<8x32xf32, #tpu.memory_space<vmem>>) attributes {dimension_semantics = [#tpu.dimension_semantics<parallel>, #tpu.dimension_semantics<parallel>, #tpu.dimension_semantics<arbitrary>], iteration_bounds = array<i64: 2, 1, 4>, scalar_prefetch = 0 : i64, scratch_operands = 1 : i64, tpu.core_type = #tpu.core_type<tc>, window_params = [{transform_indices = @transform_0, window_bounds = array<i64: 1, 8, 32>}, {transform_indices = @transform_1, window_bounds = array<i64: 1, 8, 32>}, {transform_indices = @transform_2, window_bounds = array<i64: 1, 32, 8>}, {transform_indices = @transform_3, window_bounds = array<i64: 1, 32, 8>}, {transform_indices = @transform_4, window_bounds = array<i64: 1, 32, 8>}, {transform_indices = @transform_5, window_bounds = array<i64: 1, 8, 32>}, {transform_indices = @transform_6, window_bounds = array<i64: 1, 8, 32>}]} {
    %c0_i32 = arith.constant 0 : i32
    %0 = arith.cmpi eq, %arg2, %c0_i32 : i32
    %1 = arith.extui %0 : i1 to i32
    %c0_i32_0 = arith.constant 0 : i32
    %2 = arith.cmpi ne, %1, %c0_i32_0 : i32
    scf.if %2 {
      %cst_34 = arith.constant 0.000000e+00 : f32
      %47 = vector.broadcast %cst_34 : f32 to vector<8x32xf32>
      %c0_35 = arith.constant 0 : index
      %c0_36 = arith.constant 0 : index
      %48 = vector.load %arg10[%c0_35, %c0_36] : memref<8x32xf32, #tpu.memory_space<vmem>>, vector<8x32xf32>
      tpu.vector_store %arg10[%c0_35, %c0_36], %47 {strides = array<i32>} : memref<8x32xf32, #tpu.memory_space<vmem>>, vector<8x32xf32>,
    } else {
    }
    %c0 = arith.constant 0 : index
    %c0_1 = arith.constant 0 : index
    %c0_2 = arith.constant 0 : index
    %3 = vector.load %arg3[%c0, %c0_1, %c0_2] : memref<1x8x32xf32, #tpu.memory_space<vmem>>, vector<1x8x32xf32>
    %4 = vector.shape_cast %3 : vector<1x8x32xf32> to vector<8x32xf32>
    %c0_3 = arith.constant 0 : index
    %c0_4 = arith.constant 0 : index
    %c0_5 = arith.constant 0 : index
    %5 = vector.load %arg4[%c0_3, %c0_4, %c0_5] : memref<1x8x32xf32, #tpu.memory_space<vmem>>, vector<1x8x32xf32>
    %6 = vector.shape_cast %5 : vector<1x8x32xf32> to vector<8x32xf32>
    %c0_6 = arith.constant 0 : index
    %c0_7 = arith.constant 0 : index
    %c0_8 = arith.constant 0 : index
    %7 = vector.load %arg5[%c0_6, %c0_7, %c0_8] : memref<1x32x8xf32, #tpu.memory_space<vmem>>, vector<1x32x8xf32>
    %8 = vector.shape_cast %7 : vector<1x32x8xf32> to vector<32x8xf32>
    %c0_9 = arith.constant 0 : index
    %c0_10 = arith.constant 0 : index
    %c0_11 = arith.constant 0 : index
    %9 = vector.load %arg6[%c0_9, %c0_10, %c0_11] : memref<1x32x8xf32, #tpu.memory_space<vmem>>, vector<1x32x8xf32>
    %10 = vector.shape_cast %9 : vector<1x32x8xf32> to vector<32x8xf32>
    %c0_12 = arith.constant 0 : index
    %c0_13 = arith.constant 0 : index
    %c0_14 = arith.constant 0 : index
    %11 = vector.load %arg7[%c0_12, %c0_13, %c0_14] : memref<1x32x8xf32, #tpu.memory_space<vmem>>, vector<1x32x8xf32>
    %12 = vector.shape_cast %11 : vector<1x32x8xf32> to vector<32x8xf32>
    %c0_15 = arith.constant 0 : index
    %c0_16 = arith.constant 0 : index
    %c0_17 = arith.constant 0 : index
    %13 = vector.load %arg8[%c0_15, %c0_16, %c0_17] : memref<1x8x32xf32, #tpu.memory_space<vmem>>, vector<1x8x32xf32>
    %14 = vector.shape_cast %13 : vector<1x8x32xf32> to vector<8x32xf32>
    %cst = arith.constant dense<0.000000e+00> : vector<8x8xf32>
    %15 = tpu.matmul %4, %8, %cst {dimension_numbers = #tpu.dot_dimension_numbers<[1], [0], [0], [1], [0, 0, 1, 1], [], []>} : vector<8x32xf32>, vector<32x8xf32>, vector<8x8xf32> -> vector<8x8xf32>
    %cst_18 = arith.constant dense<0.000000e+00> : vector<8x8xf32>
    %16 = tpu.matmul %6, %10, %cst_18 {dimension_numbers = #tpu.dot_dimension_numbers<[1], [0], [0], [1], [0, 0, 1, 1], [], []>} : vector<8x32xf32>, vector<32x8xf32>, vector<8x8xf32> -> vector<8x8xf32>
    %cst_19 = arith.constant dense<0.000000e+00> : vector<8x8xf32>
    %17 = tpu.matmul %6, %12, %cst_19 {dimension_numbers = #tpu.dot_dimension_numbers<[1], [0], [0], [1], [0, 0, 1, 1], [], []>} : vector<8x32xf32>, vector<32x8xf32>, vector<8x8xf32> -> vector<8x8xf32>
    %cst_20 = arith.constant dense<0.000000e+00> : vector<8x8xf32>
    %18 = tpu.matmul %15, %16, %cst_20 {dimension_numbers = #tpu.dot_dimension_numbers<[1], [1], [0], [0], [0, 0, 1, 0], [], []>} : vector<8x8xf32>, vector<8x8xf32>, vector<8x8xf32> -> vector<8x8xf32>
    %cst_21 = arith.constant 0.353553385 : f32
    %19 = vector.broadcast %cst_21 : f32 to vector<8x8xf32>
    %20 = arith.mulf %18, %19 : vector<8x8xf32>
    %21 = tpu.iota {dimensions = array<i32: 1>} : vector<1x8xi32>
    %c0_i32_22 = arith.constant 0 : i32
    %22 = vector.broadcast %c0_i32_22 : i32 to vector<1x8xi32>
    %23 = arith.cmpi eq, %21, %22 : vector<1x8xi32>
    %cst_23 = arith.constant 5.000000e-01 : f32
    %cst_24 = arith.constant 0.000000e+00 : f32
    %24 = vector.broadcast %cst_23 : f32 to vector<1x8xf32>
    %25 = vector.broadcast %cst_24 : f32 to vector<1x8xf32>
    %26 = arith.select %23, %24, %25 : vector<1x8xi1>, vector<1x8xf32>
    %27 = vector.broadcast %26 : vector<1x8xf32> to vector<8x8xf32>
    %28 = arith.addf %20, %27 : vector<8x8xf32>
    %cst_25 = arith.constant dense<0xFF800000> : vector<8xf32>
    %29 = vector.multi_reduction <maximumf>, %28, %cst_25 [1] : vector<8x8xf32> to vector<8xf32>
    %30 = vector.shape_cast %29 : vector<8xf32> to vector<8x1xf32>
    %31 = vector.broadcast %30 : vector<8x1xf32> to vector<8x8xf32>
    %32 = arith.subf %28, %31 : vector<8x8xf32>
    %33 = math.exp %32 : vector<8x8xf32>
    %cst_26 = arith.constant dense<0.000000e+00> : vector<8xf32>
    %34 = vector.multi_reduction <add>, %33, %cst_26 [1] : vector<8x8xf32> to vector<8xf32>
    %35 = vector.shape_cast %34 : vector<8xf32> to vector<8x1xf32>
    %36 = tpu.reciprocal %35 : vector<8x1xf32> -> vector<8x1xf32>
    %37 = vector.broadcast %36 : vector<8x1xf32> to vector<8x8xf32>
    %38 = arith.mulf %33, %37 : vector<8x8xf32>
    %cst_27 = arith.constant dense<0.000000e+00> : vector<8x8xf32>
    %39 = tpu.matmul %38, %17, %cst_27 {dimension_numbers = #tpu.dot_dimension_numbers<[1], [0], [0], [1], [0, 0, 1, 1], [], []>} : vector<8x8xf32>, vector<8x8xf32>, vector<8x8xf32> -> vector<8x8xf32>
    %c0_28 = arith.constant 0 : index
    %c0_29 = arith.constant 0 : index
    %40 = vector.load %arg10[%c0_28, %c0_29] : memref<8x32xf32, #tpu.memory_space<vmem>>, vector<8x32xf32>
    %cst_30 = arith.constant dense<0.000000e+00> : vector<8x32xf32>
    %41 = tpu.matmul %39, %14, %cst_30 {dimension_numbers = #tpu.dot_dimension_numbers<[1], [0], [0], [1], [0, 0, 1, 1], [], []>} : vector<8x8xf32>, vector<8x32xf32>, vector<8x32xf32> -> vector<8x32xf32>
    %42 = arith.addf %40, %41 : vector<8x32xf32>
    %c0_31 = arith.constant 0 : index
    %c0_32 = arith.constant 0 : index
    %43 = vector.load %arg10[%c0_31, %c0_32] : memref<8x32xf32, #tpu.memory_space<vmem>>, vector<8x32xf32>
    tpu.vector_store %arg10[%c0_31, %c0_32], %42 {strides = array<i32>} : memref<8x32xf32, #tpu.memory_space<vmem>>, vector<8x32xf32>,
    %c3_i32 = arith.constant 3 : i32
    %44 = arith.cmpi eq, %arg2, %c3_i32 : i32
    %45 = arith.extui %44 : i1 to i32
    %c0_i32_33 = arith.constant 0 : i32
    %46 = arith.cmpi ne, %45, %c0_i32_33 : i32
    scf.if %46 {
      %c0_34 = arith.constant 0 : index
      %c0_35 = arith.constant 0 : index
      %47 = vector.load %arg10[%c0_34, %c0_35] : memref<8x32xf32, #tpu.memory_space<vmem>>, vector<8x32xf32>
      %c0_36 = arith.constant 0 : index
      %c0_37 = arith.constant 0 : index
      %c0_38 = arith.constant 0 : index
      %48 = vector.load %arg9[%c0_36, %c0_37, %c0_38] : memref<1x8x32xf32, #tpu.memory_space<vmem>>, vector<1x8x32xf32>
      %49 = vector.shape_cast %48 : vector<1x8x32xf32> to vector<8x32xf32>
      %50 = vector.shape_cast %47 : vector<8x32xf32> to vector<1x8x32xf32>
      tpu.vector_store %arg9[%c0_36, %c0_37, %c0_38], %50 {strides = array<i32>} : memref<1x8x32xf32, #tpu.memory_space<vmem>>, vector<1x8x32xf32>,
    } else {
    }
    return
  }
  func.func @transform_0(%arg0: i32, %arg1: i32, %arg2: i32) -> (i32, i32, i32) {
    %c0_i32 = arith.constant 0 : i32
    %c0_i32_0 = arith.constant 0 : i32
    return %arg0, %arg1, %c0_i32 : i32, i32, i32
  }
  func.func @transform_1(%arg0: i32, %arg1: i32, %arg2: i32) -> (i32, i32, i32) {
    %c0_i32 = arith.constant 0 : i32
    %c0_i32_0 = arith.constant 0 : i32
    %c0_i32_1 = arith.constant 0 : i32
    return %arg0, %c0_i32, %c0_i32_0 : i32, i32, i32
  }
  func.func @transform_2(%arg0: i32, %arg1: i32, %arg2: i32) -> (i32, i32, i32) {
    %c0_i32 = arith.constant 0 : i32
    %c0_i32_0 = arith.constant 0 : i32
    %c0_i32_1 = arith.constant 0 : i32
    return %arg2, %c0_i32, %c0_i32_0 : i32, i32, i32
  }
  func.func @transform_3(%arg0: i32, %arg1: i32, %arg2: i32) -> (i32, i32, i32) {
    %c0_i32 = arith.constant 0 : i32
    %c0_i32_0 = arith.constant 0 : i32
    %c0_i32_1 = arith.constant 0 : i32
    return %arg2, %c0_i32, %c0_i32_0 : i32, i32, i32
  }
  func.func @transform_4(%arg0: i32, %arg1: i32, %arg2: i32) -> (i32, i32, i32) {
    %c0_i32 = arith.constant 0 : i32
    %c0_i32_0 = arith.constant 0 : i32
    %c0_i32_1 = arith.constant 0 : i32
    return %arg2, %c0_i32, %c0_i32_0 : i32, i32, i32
  }
  func.func @transform_5(%arg0: i32, %arg1: i32, %arg2: i32) -> (i32, i32, i32) {
    %c0_i32 = arith.constant 0 : i32
    %c0_i32_0 = arith.constant 0 : i32
    %c0_i32_1 = arith.constant 0 : i32
    return %arg2, %c0_i32, %c0_i32_0 : i32, i32, i32
  }
  func.func @transform_6(%arg0: i32, %arg1: i32, %arg2: i32) -> (i32, i32, i32) {
    %c0_i32 = arith.constant 0 : i32
    %c0_i32_0 = arith.constant 0 : i32
    return %arg0, %arg1, %c0_i32 : i32, i32, i32
  }
}

</mosaic_0001>

<bundles_post_ra>
// kernel: tpu_custom_call.1
= control target key start
LH: loop header
LB: loop body
LE: loop exit
PB: predicated region body
PF: predicated region fallthrough
CT: control target
= control target key end

     0   :  { %s1510_s0 = inlined_call_operand.vmem [shape: f32[2,8,32], index: 0, kind: input, shape index: {}]   ;;  %s1511_s1 = inlined_call_operand.vmem [shape: f32[2,8,32], index: 1, kind: input, shape index: {}]   ;;  %s1512_s2 = inlined_call_operand.vmem [shape: f32[4,32,8], index: 2, kind: input, shape index: {}]   ;;  %s1513_s3 = inlined_call_operand.vmem [shape: f32[4,32,8], index: 3, kind: input, shape index: {}]   ;;  %s1514_s4 = inlined_call_operand.vmem [shape: f32[4,32,8], index: 4, kind: input, shape index: {}]   ;;  %s1515_s5 = inlined_call_operand.vmem [shape: f32[4,8,32], index: 5, kind: input, shape index: {}]   ;;  %s1516_s6 = inlined_call_operand.hbm [shape: f32[2,8,32], index: 6, kind: output, shape index: {}]  }
   0x1   :  { %1523 = sst [smem:[#allocation13_spill]] %s1510_s0 }
   0x2   :  { %11 = vsyncpa [#allocation4], 0 }
   0x3   :  { %13 = vsyncpa [#allocation4 + $0x1], 0  ;;  %s1323_s21 = smov 0   ;;  %s1325_s22 = smov 0  }
   0x4   :  { %s1327_s23 = smov 0   ;;  %s1329_s24 = smov 0  }
   0x5   :  { %s1331_s25 = smov 0   ;;  %s1333_s26 = smov 0  }
   0x6   :  { %s1335_s27 = smov 0   ;;  %s1337_s28 = smov 0  }
   0x7 LB: > { %1524 = sst [smem:[#allocation6_spill]] %s1262_s23  ;;  %s1012_s29 = sadd.s32 4294967295, %s1282_s28   ;;  %s1282_s28 = sphi %s1337_s28, %s19_s28   ;;  %s1278_s27 = sphi %s1335_s27, %s1541_s27   ;;  %s1274_s26 = sphi %s1333_s26, %s1540_s26   ;;  %s1270_s25 = sphi %s1331_s25, %s1539_s25   ;;  %s1266_s24 = sphi %s1329_s24, %s1538_s24   ;;  %s1262_s23 = sphi %s1327_s23, %s1537_s23   ;;  %s1258_s22 = sphi %s1325_s22, %s1543_s22   ;;  %s1254_s21 = sphi %s1323_s21, %s1542_s21  }
   0x8   : > { %1525 = sst [smem:[#allocation7_spill]] %s1274_s26  ;;  %s1013_s30 = sadd.s32 4294967294, %s1282_s28  }
   0x9   : > { %1526 = sst [smem:[#allocation8_spill]] %s1278_s27  ;;  %s31_s7 = sadd.s32 1, %s1274_s26 }
   0xa   : > { %p32_p0 = scmp.ge.s32.totalorder %s31_s7, 4  ;;  %s38_s8 = sadd.s32 1, %s1278_s27 }
   0xb   : > { %p215_p1 = scmp.ne.s32.totalorder %s1262_s23, %s1258_s22  ;;  %p216_p2 = scmp.eq.s32.totalorder %s1012_s29, 7 }
   0xc   : > { %s1545_s7 = smov (%p32_p0, %s31_s7), 0  ;;  %s1547_s8 = smov (!%p32_p0, %s38_s8), %s1278_s27 }
   0xd   : > { %1527 = sst [smem:[#allocation9_spill]] %s1545_s7  ;;  %p1372_p3 = por %p216_p2, %p215_p1 }
   0xe   : > { %p221_p4 = scmp.ne.s32.totalorder %s1258_s22, %s1254_s21  ;;  %p40_p5 = scmp.ge.s32.totalorder %s1547_s8, 2 }
   0xf   : > { %p222_p6 = scmp.eq.s32.totalorder %s1013_s30, 7  ;;  %p1016_p7 = scmp.ge.s32.totalorder %s1282_s28, 1 }
  0x10   : > { %p288_p8 = scmp.lt.s32.totalorder %s1282_s28, 9  ;;  %s1549_s8 = smov (%p40_p5, %s1547_s8), 0 }
  0x11   : > { %1529 = sst [smem:[#allocation10_spill]] %s1549_s8  ;;  %p1382_p9 = por %p222_p6, %p221_p4 }
  0x12   : > { %p289_p10 = pnand %p1016_p7, %p288_p8  ;;  %s200_s11 = ssub.s32 %s1278_s27, %s1549_s8 }
  0x13   : > { %s1530_s10 = scalar_select %p1382_p9, 1, 0 }
  0x14   : > { %s205_s12 = sadd.s32 1, %s1262_s23  ;;  %p203_p11 = scmp.eq.s32.totalorder %s200_s11, 0 }
  0x15   : > { %1531 = sst [smem:[#allocation11_spill]] %s1530_s10  ;;  %292 = sbr.rel (%p289_p10) target bundleno = 1175 (0x497), region = 44 }
  0x16   : > { %s1390_s13 = scalar_select %p203_p11, %s1262_s23, %s205_s12  }
  0x17   : > { %s1519_s14 = sand.u32 (!%p289_p10), 1, %s1258_s22   ;;  %p343_p12 = scmp.lt.s32.totalorder (!%p289_p10), %s1270_s25, 1 }
  0x18   : > { %1532 = sst [smem:[#allocation12_spill]] %s1390_s13  ;;  %s1396_s15 = sshll.u32 (!%p289_p10), %s1519_s14, 3 }
  0x19   : > { %p354_p13 = scmp.lt.s32.totalorder (!%p289_p10), %s1266_s24, 3  ;;  %s1533_s0 = sld [smem:[#allocation13_spill]] (!%p289_p10) }
  0x1a   : > { %s344_s16 = scalar_select %p343_p12, %s1270_s25, 1 }
  0x1b   : > { %s355_s17 = scalar_select %p354_p13, %s1266_s24, 3 }
  0x1c   : > { %s1018_s18 = sshll.u32 %s344_s16, 3  ;;  %p1027_p0 = scmp.ne.s32.totalorder %s1266_s24, 0 }
  0x1d   : > { %s1409_s12 = scalar_lea.vmem %s1511_s1, %s1018_s18  ;;  %s1040_s8 = sshll.u32 %s355_s17, 5 }
  0x1e   : > { %s1026_s7 = sshll.u32 %s355_s17, 3  ;;  %s1414_s26 = scalar_lea.vmem %s1512_s2, %s1040_s8 }
  0x1f   : > { %s1404_s29 = scalar_lea.vmem %s1533_s0, %s1018_s18  ;;  %s363_s16 = scalar_lea.vmem %s1513_s3, %s1040_s8 }
  0x20   : > { %s1422_s20 = scalar_lea.vmem %s1514_s4, %s1040_s8  ;;  %s1427_s18 = scalar_lea.vmem %s1515_s5, %s1026_s7 }
  0x21   : > { %s342_s17 = scalar_lea.vmem [#allocation3], %s1396_s15  ;;  %376 = sbr.rel (%p1027_p0) target bundleno = 40 (0x28), region = 48 }
  0x26   : > { %vm377_vm0 = vcmask 261120   ;;  %v1284_v0 = vmov 0.0  }
  0x27   : > { %378 = vst.msk [vmem:[#allocation2] sm:$0xff] %vm377_vm0, %v1284_v0 }
  0x28 PF: > { %v388_v1 = vld [vmem:[%s363_s16 + $0x18] sm:$0xff]  ;;  %v1285_v3 = vmov 0.0   ;;  %v387_v4 = vld [vmem:[%s363_s16 + $0x10] sm:$0xff]  ;;  %v386_v6 = vld [vmem:[%s363_s16 + $0x8] sm:$0xff]  ;;  %vm394_vm1 = vcmask 261120   ;;  %vm1286_vm2 = vmmov 0   ;;  %v689_v20 = vlaneseq }
  0x29   : > { %v384_v2 = vld [vmem:[%s1414_s26 + $0x18] sm:$0xff]  ;;  %1075 = vmatprep.subr.mxu1 %v1285_v3  ;;  %1064 = vmatprep.subr.mxu0 %v1285_v3  ;;  %v383_v5 = vld [vmem:[%s1414_s26 + $0x10] sm:$0xff]  ;;  %v382_v7 = vld [vmem:[%s1414_s26 + $0x8] sm:$0xff]  ;;  %vm611_vm3 = vcmask 64512   ;;  %p1035_p1 = scmp.ne.s32.totalorder %s1266_s24, 3 }
  0x2a   : > { %1076 = vmatpush3.msra.mxu1 %v388_v1  ;;  %1065 = vmatpush3.msra.mxu0 %v384_v2  ;;  %v385_v8 = vld [vmem:[%s363_s16] sm:$0xff]  ;;  %v392_v16 = vld [vmem:[%s1422_s20 + $0x18] sm:$0xff]  ;;  %v391_v17 = vld [vmem:[%s1422_s20 + $0x10] sm:$0xff]  ;;  %v690_v21 = vand.u32 127, %v689_v20 }
  0x2b   : > { %1077 = vmatprep.subr.mxu1 %v1285_v3  ;;  %1066 = vmatprep.subr.mxu0 %v1285_v3  ;;  %v380_v9 = vld [vmem:[%s1409_s12] sm:$0xff]  ;;  %v390_v18 = vld [vmem:[%s1422_s20 + $0x8] sm:$0xff] }
  0x2c   : > { %1078 = vmatpush3.msra.mxu1 %v387_v4  ;;  %1067 = vmatpush3.msra.mxu0 %v383_v5  ;;  %v381_v10 = vld [vmem:[%s1414_s26] sm:$0xff]  ;;  %vm691_vm4 = vcmp.eq.s32.totalorder %v690_v21, 0 }
  0x2d   : > { %1079 = vmatprep.subr.mxu1 %v1285_v3  ;;  %1068 = vmatprep.subr.mxu0 %v1285_v3  ;;  %v379_v11 = vld [vmem:[%s1404_s29] sm:$0xff]  ;;  %v692_v23 = vsel %vm691_vm4, 0.5, %v1285_v3 }
  0x2e   : > { %1080 = vmatpush3.msra.mxu1 %v386_v6  ;;  %1069 = vmatpush3.msra.mxu0 %v382_v7  ;;  %v389_v19 = vld [vmem:[%s1422_s20] sm:$0xff] }
  0x2f   : > { %1081 = vmatprep.subr.mxu1 %v1285_v3  ;;  %1083 = vmatprep.mubr.msk.f32.mxu1 %vm1286_vm2, %v1285_v3  ;;  %v393_v35 = vld [vmem:[%s1427_s18] sm:$0xff] }
  0x30   : > { %1082 = vmatpush3.msra.mxu1 %v385_v8  ;;  %1070 = vmatprep.subr.mxu0 %v1285_v3  ;;  %v778_v41 = vld [vmem:[#allocation2] sm:$0xff] }
  0x31   : > { %1084 = vmatmul.mubr.msk.f32.vlgmr.msra.gmra.mxu1 %vm394_vm1, %v380_v9  ;;  %1071 = vmatpush3.msra.mxu0 %v381_v10 }
  0x32   : > { %1072 = vmatprep.mubr.msk.f32.mxu0 %vm1286_vm2, %v1285_v3  ;;  %1097 = vmatprep.subr.mxu1 %v1285_v3 }
  0x33   : > { %1073 = vmatmul.mubr.msk.f32.vlgmr.msra.gmra.mxu0 %vm394_vm1, %v379_v11  ;;  %1099 = vmatprep.mubr.msk.f32.mxu1 %vm1286_vm2, %v1285_v3 }
  0x34   : > { %1086 = vmatprep.subr.mxu0 %v1285_v3  ;;  %1094 = vmatprep.mubr.msk.f32.mxu0 %vm1286_vm2, %v1285_v3 }
  0x35   : > { %1087 = vmatpush3.msra.mxu0 %v392_v16 }
  0x36   : > { %1088 = vmatprep.subr.mxu0 %v1285_v3 }
  0x37   : > { %1089 = vmatpush3.msra.mxu0 %v391_v17 }
  0x38   : > { %1090 = vmatprep.subr.mxu0 %v1285_v3 }
  0x39   : > { %1091 = vmatpush3.msra.mxu0 %v390_v18 }
  0x3a   : > { %1092 = vmatprep.subr.mxu0 %v1285_v3 }
  0x3b   : > { %1093 = vmatpush3.msra.mxu0 %v389_v19 }
  0x3c   : > { %1095 = vmatmul.mubr.msk.f32.vlgmr.msra.gmra.mxu0 %vm394_vm1, %v380_v9  ;;  %1107 = vmatprep.subr.mxu0 %v1285_v3 }
  0x3d   : > { %1109 = vmatprep.mubr.msk.f32.mxu0 %vm1286_vm2, %v1285_v3  ;;  %1108 = vmatpush3.msra.mxu0 %v393_v35 }
  0xf1   : > { %v537_v12 = vpop.f32.mrf.mxu1 }
  0xf2   : > { %1098 = vmatpush3.xpose.msk.msra.mxu1 %vm611_vm3, %v537_v12 }
  0xf3   : > { %v464_v13 = vpop.f32.mrf.mxu0  ;;  %v1085_v14 = vpop.f32.mrf.mxu1  ;;  %1102 = vmatprep.subr.mxu1 %v1285_v3 }
  0xf5   : > { %v1074_v15 = vpop.f32.mrf.mxu0  ;;  %1100 = vmatmul.mubr.msk.f32.vlgmr.msra.gmra.mxu1 %vm611_vm3, %v464_v13 }
  0xf6   : > { %1104 = vmatprep.mubr.msk.f32.mxu1 %vm1286_vm2, %v1285_v3 }
  0xfc   : > { %v607_v33 = vpop.f32.mrf.mxu0 }
  0xfd   : > { %1103 = vmatpush3.msra.mxu1 %v607_v33 }
  0xfe   : > { %v1096_v34 = vpop.f32.mrf.mxu0 }
 0x1b5   : > { %v684_v22 = vpop.f32.mrf.mxu1 }
 0x1b6   : > { %v688_v24 = vmul.f32 0.35355338, %v684_v22 }
 0x1b7   : > { %v1101_v25 = vpop.f32.mrf.mxu1 }
 0x1b8   : > { %v693_v26 = vadd.f32 %v692_v23, %v688_v24 }
 0x1ba   : > { %v694_v27 = vsel %vm611_vm3, %v693_v26, -inf }
 0x1bb   : > { %695 = vmax.xlane.f32.xlu0 %v694_v27 }
 0x244   : > { %v696_v28 = vpop.xlane.xlu0 %695 }
 0x245   : > { %v697_v29 = vsub.f32 %v693_v26, %v696_v28 }
 0x247   : > { %v698_v30 = vmul.f32 1.442695, %v697_v29 }
 0x249   : > { %1186 = vpow2.f32 %v698_v30 }
 0x256   : > { %v1187_v31 = vpop.eup %1186 }
 0x257   : > { %v700_v32 = vsel %vm611_vm3, %v1187_v31, 0.0 }
 0x258   : > { %701 = vadd.xlane.f32.xlu0 %v700_v32 }
 0x2e1   : > { %v702_v36 = vpop.xlane.xlu0 %701 }
 0x2e2   : > { %1188 = vrcp.f32 %v702_v36 }
 0x2ef   : > { %v1189_v37 = vpop.eup %1188 }
 0x2f0   : > { %v704_v38 = vmul.f32 %v1189_v37, %v1187_v31 }
 0x2f2   : > { %1105 = vmatmul.mubr.msk.f32.vlgmr.msra.gmra.mxu1 %vm611_vm3, %v704_v38 }
 0x3b2   : > { %v774_v39 = vpop.f32.mrf.mxu1 }
 0x3b3   : > { %1110 = vmatmul.mubr.msk.f32.vlgmr.msra.gmra.mxu0 %vm611_vm3, %v774_v39 }
 0x3b4   : > { %v1106_v40 = vpop.f32.mrf.mxu1 }
 0x472   : > { %857 = sbr.rel (%p1035_p1) target bundleno = 1151 (0x47f), region = 52 }
 0x473   : > { %v848_v42 = vpop.f32.mrf.mxu0 }
 0x474   : > { %v852_v43 = vadd.f32 %v848_v42, %v778_v41 }
 0x475   : > { %v1111_v44 = vpop.f32.mrf.mxu0 }
 0x476   : > { %853 = vst.msk [vmem:[#allocation2] sm:$0xff] %vm394_vm1, %v852_v43 }
 0x47d   : > { %v858_v45 = vld [vmem:[#allocation2] sm:$0xff] }
 0x47e   : > { %859 = vst.msk [vmem:[%s342_s17] sm:$0xff] %vm394_vm1, %v858_v45 }
 0x47f PF: > { %s1037_s0 = sshll.u32 %s1270_s25, 7  ;;  %s875_s7 = sshll.u32 %s342_s17, 4  ;;  %s876_s7 = int_to_ptr.vmem [resolvable:$true] %s875_s7 }
 0x480   : > { %s873_s27 = scalar_lea.hbm %s1516_s6, %s1037_s0  ;;  %s1534_s24 = sand.u32 1, %s1258_s22  }
 0x481   : > { %s861_s8 = scalar_lea.sflag [#allocation4], %s1534_s24  ;;  %s1190_s10 = scalar_lea.vmem %s876_s7, 128 }
 0x482   : > { %p1191_p2 = scmp.ne.s32.totalorder %s876_s7, %s1190_s10  ;;  %s1287_s13 = smov [#allocation3]  }
 0x483   : > { %s1194_s14 = sshll.u32 %s1287_s13, 4  ;;  %s1195_s14 = int_to_ptr.vmem [resolvable:$false] %s1194_s14 }
 0x484   : > { %p1192_p4 = pnand %p1191_p2, %p1372_p3  ;;  %s1196_s29 = scalar_lea.vmem %s1195_s14, 256 }
 0x485   : > { %p1197_p6 = scmp.lt.s32.totalorder %s876_s7, %s1195_s14  ;;  %p1198_p7 = scmp.lt.s32.totalorder %s1196_s29, %s1190_s10 }
 0x486   : > { %p1193_p5 = pneg %p1192_p4 }
 0x487   : > { %p1199_p8 = por %p1198_p7, %p1197_p6 }
 0x489   : > { %p1200_p10 = pnand %p1199_p8, %p1193_p5 }
 0x48b   : > { %1203 = shalt.err (!%p1200_p10)
}
 0x48c   : > { %s1204_s25 = scalar_lea.hbm %s873_s27, 128  ;;  %s1208_s12 = scalar_lea.hbm %s1516_s6, 256 }
 0x48d   : > { %p1205_p11 = scmp.ne.s32.totalorder %s873_s27, %s1204_s25  ;;  %p1209_p0 = scmp.lt.s32.totalorder %s873_s27, %s1516_s6 }
 0x48e   : > { %p1210_p1 = scmp.lt.s32.totalorder %s1208_s12, %s1204_s25 }
 0x48f   : > { %p1206_p12 = pnand %p1205_p11, %p1372_p3 }
 0x490   : > { %p1211_p2 = por %p1210_p1, %p1209_p0 }
 0x491   : > { %p1207_p13 = pneg %p1206_p12 }
 0x493   : > { %p1212_p4 = pnand %p1211_p2, %p1207_p13 }
 0x495   : > { %1215 = shalt.err (!%p1212_p4)
}
 0x496   : > { %1112 = dma.vmem_to_hbm [thread:$0]  (%p1372_p3), %s876_s7, 128, %s873_s27, %s861_s8  }
 0x497 PF: > { %p1118_p5 = scmp.ge.s32.totalorder %s1282_s28, 2  ;;  %s887_s30 = sand.u32 1, %s1254_s21  }
 0x498   : > { %s888_s18 = scalar_lea.sflag [#allocation4], %s887_s30 }
 0x499   : > { %p1115_p6 = pnand %p1118_p5, %p1382_p9 }
 0x49b   : > { %p1116_p7 = pneg %p1115_p6 }
 0x49d   : > { %1249 = dma.done.wait (%p1116_p7), %s888_s18, 128  }
 0x49e   : > { %1251 = vsyncadd (%p1116_p7), %s888_s18, 4294967168  ;;  %s19_s28 = sadd.s32 1, %s1282_s28   ;;  %s1536_s17 = sld [smem:[#allocation6_spill]] }
 0x49f   : > { %p16_p8 = scmp.ge.s32.totalorder %s19_s28, 10   ;;  %s1537_s23 = sld [smem:[#allocation12_spill]] }
 0x4a0   : > { %s1538_s24 = sld [smem:[#allocation7_spill]]  ;;  %s1542_s21 = smov %s1258_s22 }
 0x4a1   : > { %s1539_s25 = sld [smem:[#allocation8_spill]]  ;;  %18 = sbr.rel (!%p16_p8) target bundleno = 7 (0x7), region = 102 }
 0x4a2   : > { %s1540_s26 = sld [smem:[#allocation9_spill]] }
 0x4a3   : > { %s1541_s27 = sld [smem:[#allocation10_spill]] }
 0x4a4   : > { %s1543_s22 = smov %s1536_s17 }
 0x4a6   :  { %893 = vsyncpa [#allocation4], 1 }
 0x4a7   :  { %895 = vsyncpa [#allocation4 + $0x1], 1 }

</bundles_post_ra>
